<compile_context>
chip_gen: v6e
topology: v6e:2x2x1
jax: 0.10.0
libtpu: 0.0.40
codegen_flags: <defaults>
</compile_context>

<pallas_src>
import jax
import jax.numpy as jnp
from jax.experimental import pallas as pl
from jax.experimental.pallas import tpu as pltpu


def _round_up(n, m):
    return ((n + m - 1) // m) * m


def mlp_kernel(x_ref, w1_ref, b1_ref, w2_ref, b2_ref, out_ref):
    """One batch tile: out = sigmoid(x @ W1 + b1) @ W2 + b2.

    x/W1/W2 are bf16 (MXU-native), biases f32. Both dots accumulate in f32;
    elementwise work (bias add, sigmoid) runs in f32 so it is safe on v5e.
    """
    h = jnp.dot(x_ref[...], w1_ref[...], preferred_element_type=jnp.float32)
    h = jax.nn.sigmoid(h + b1_ref[...])                      # (TB, Hp) f32
    o = jnp.dot(h.astype(w2_ref.dtype), w2_ref[...],
                preferred_element_type=jnp.float32)
    out_ref[...] = (o + b2_ref[...]).astype(out_ref.dtype)   # lane-dense store


def mlp_forward(x, w1, b1, w2, b2, *, block_batch=None, vmem_limit_bytes=None):
    """x: [B, F], w1: [F, H], b1: [H], w2: [H, C], b2: [C] -> [B, C] (f32)."""
    B, F = x.shape
    H = w1.shape[1]
    C = w2.shape[1]

    f32, bf16 = jnp.float32, jnp.bfloat16

    # Lane-aligned padded feature dims (128 lanes).
    Fp = _round_up(F, 128)
    Hp = _round_up(H, 128)
    Cp = _round_up(C, 128)   # lane-dense output: avoid masked stores at C << 128

    # Batch tile: multiple of 16 (bf16 sublane pack). Keep each bf16 x buffer
    # <= ~4 MiB so double-buffered x + resident weights + f32 out fit easily
    # inside v7x's 64 MiB VMEM.
    if block_batch is None:
        max_tb_vmem = max(16, (4 * 1024 * 1024) // (Fp * 2))
        block_batch = min(512, max_tb_vmem, _round_up(B, 16))
    TB = _round_up(block_batch, 16)
    Bp = _round_up(B, TB)

    # Zero-pad. Zeros are exact no-ops: padded hidden units hit zero W2 rows,
    # padded classes see zero W2 columns / zero b2 (sliced off below anyway).
    xp = jnp.zeros((Bp, Fp), f32).at[:B, :F].set(x.astype(f32)).astype(bf16)
    w1p = jnp.zeros((Fp, Hp), f32).at[:F, :H].set(w1.astype(f32)).astype(bf16)
    w2p = jnp.zeros((Hp, Cp), f32).at[:H, :C].set(w2.astype(f32)).astype(bf16)
    b1p = jnp.zeros((1, Hp), f32).at[0, :H].set(b1.astype(f32))
    b2p = jnp.zeros((1, Cp), f32).at[0, :C].set(b2.astype(f32))

    if vmem_limit_bytes is None:
        need = (2 * TB * Fp * 2              # double-buffered x (bf16)
                + Fp * Hp * 2 + Hp * Cp * 2  # resident weights (bf16)
                + TB * Hp * 4                # hidden activations (f32)
                + 2 * TB * Cp * 4            # double-buffered out (f32)
                + (Hp + Cp) * 4)             # biases (f32)
        vmem_limit_bytes = int(min(max(2 * need, 16 * 1024 * 1024),
                                   48 * 1024 * 1024))

    grid = (Bp // TB,)

    out_padded = pl.pallas_call(
        mlp_kernel,
        out_shape=jax.ShapeDtypeStruct((Bp, Cp), f32),
        grid=grid,
        in_specs=[
            pl.BlockSpec((TB, Fp), lambda i: (i, 0)),   # x: streamed per tile
            pl.BlockSpec((Fp, Hp), lambda i: (0, 0)),   # W1: VMEM-resident
            pl.BlockSpec((1, Hp), lambda i: (0, 0)),    # b1
            pl.BlockSpec((Hp, Cp), lambda i: (0, 0)),   # W2
            pl.BlockSpec((1, Cp), lambda i: (0, 0)),    # b2
        ],
        out_specs=pl.BlockSpec((TB, Cp), lambda i: (i, 0)),
        compiler_params=pltpu.CompilerParams(
            dimension_semantics=("parallel",),          # megacore shard on v7x
            vmem_limit_bytes=vmem_limit_bytes,
        ),
    )(xp, w1p, b1p, w2p, b2p)

    return out_padded[:B, :C]

    # TODO(synk): if F ever grows so that (TB, Fp) + (Fp, Hp) no longer fit
    # VMEM, add a K-reduction grid axis over F with an f32 scratch accumulator
    # (pl.when init/finalize), reduction axis last and marked "arbitrary".


def reference_forward(x, w1, b1, w2, b2):
    h = jax.nn.sigmoid(x @ w1 + b1)
    return h @ w2 + b2


def reference_forward_bf16_matched(x, w1, b1, w2, b2):
    """Reference mimicking the kernel's bf16 operand / f32 accumulate path."""
    up = lambda a: a.astype(jnp.bfloat16).astype(jnp.float32)
    hi = jax.lax.Precision.HIGHEST
    h = jax.nn.sigmoid(jnp.dot(up(x), up(w1), precision=hi) + b1)
    return jnp.dot(up(h), up(w2), precision=hi) + b2


if __name__ == "__main__":
    # Shapes consistent with the module: num_input_features=32, num_hidden=32,
    # num_classes=8. Batch 64 with an explicit 16-row tile exercises the
    # batch-tiled, pipelined grid (grid=(4,)).
    B, F, H, C = 64, 32, 32, 8

    key = jax.random.PRNGKey(0)
    kx, kw1, kb1, kw2, kb2 = jax.random.split(key, 5)

    x = jax.random.normal(kx, (B, F), dtype=jnp.float32)
    # Mimic PyTorch nn.Linear default init scale: U(-1/sqrt(in), 1/sqrt(in)).
    w1 = jax.random.uniform(kw1, (F, H), jnp.float32, -1.0, 1.0) / jnp.sqrt(F)
    b1 = jax.random.uniform(kb1, (H,), jnp.float32, -1.0, 1.0) / jnp.sqrt(F)
    w2 = jax.random.uniform(kw2, (H, C), jnp.float32, -1.0, 1.0) / jnp.sqrt(H)
    b2 = jax.random.uniform(kb2, (C,), jnp.float32, -1.0, 1.0) / jnp.sqrt(H)

    # Tiled path (grid of 4 batch tiles).
    out_tiled = mlp_forward(x, w1, b1, w2, b2, block_batch=16)
    jax.block_until_ready(out_tiled)
    # Default auto-tile path (single tile at this tiny size).
    out_auto = mlp_forward(x, w1, b1, w2, b2)
    jax.block_until_ready(out_auto)

    ref_f32 = reference_forward(x, w1, b1, w2, b2)
    ref_bf16 = reference_forward_bf16_matched(x, w1, b1, w2, b2)

    for out in (out_tiled, out_auto):
        assert out.shape == (B, C)
        assert jnp.allclose(out, ref_bf16, atol=2e-3, rtol=2e-3), \
            "mismatch vs bf16-matched reference"
        assert jnp.allclose(out, ref_f32, atol=5e-2, rtol=5e-2), \
            "mismatch vs f32 reference"

    print("KERNEL_OK")
</pallas_src>

<mosaic_0001>
module attributes {stable_mosaic.version = 11 : i64} {
  func.func @mlp_kernel(%arg0: i32, %arg1: memref<16x128xbf16, #tpu.memory_space<vmem>>, %arg2: memref<128x128xbf16, #tpu.memory_space<vmem>>, %arg3: memref<1x128xf32, #tpu.memory_space<vmem>>, %arg4: memref<128x128xbf16, #tpu.memory_space<vmem>>, %arg5: memref<1x128xf32, #tpu.memory_space<vmem>>, %arg6: memref<16x128xf32, #tpu.memory_space<vmem>>) attributes {dimension_semantics = [#tpu.dimension_semantics<parallel>], iteration_bounds = array<i64: 4>, scalar_prefetch = 0 : i64, scratch_operands = 0 : i64, tpu.core_type = #tpu.core_type<tc>, window_params = [{transform_indices = @transform_0, window_bounds = array<i64: 16, 128>}, {pipeline_mode = #tpu.pipeline_mode<synchronous>, transform_indices = @transform_1, window_bounds = array<i64: 128, 128>}, {pipeline_mode = #tpu.pipeline_mode<synchronous>, transform_indices = @transform_2, window_bounds = array<i64: 1, 128>}, {pipeline_mode = #tpu.pipeline_mode<synchronous>, transform_indices = @transform_3, window_bounds = array<i64: 128, 128>}, {pipeline_mode = #tpu.pipeline_mode<synchronous>, transform_indices = @transform_4, window_bounds = array<i64: 1, 128>}, {transform_indices = @transform_5, window_bounds = array<i64: 16, 128>}]} {
    %c0 = arith.constant 0 : index
    %c0_0 = arith.constant 0 : index
    %0 = vector.load %arg1[%c0, %c0_0] : memref<16x128xbf16, #tpu.memory_space<vmem>>, vector<16x128xbf16>
    %c0_1 = arith.constant 0 : index
    %c0_2 = arith.constant 0 : index
    %1 = vector.load %arg2[%c0_1, %c0_2] : memref<128x128xbf16, #tpu.memory_space<vmem>>, vector<128x128xbf16>
    %cst = arith.constant dense<0.000000e+00> : vector<16x128xf32>
    %2 = tpu.matmul %0, %1, %cst {dimension_numbers = #tpu.dot_dimension_numbers<[1], [0], [0], [1], [0, 0, 1, 1], [], []>} : vector<16x128xbf16>, vector<128x128xbf16>, vector<16x128xf32> -> vector<16x128xf32>
    %c0_3 = arith.constant 0 : index
    %c0_4 = arith.constant 0 : index
    %3 = vector.load %arg3[%c0_3, %c0_4] : memref<1x128xf32, #tpu.memory_space<vmem>>, vector<1x128xf32>
    %4 = vector.broadcast %3 : vector<1x128xf32> to vector<16x128xf32>
    %5 = arith.addf %2, %4 : vector<16x128xf32>
    %6 = arith.negf %5 : vector<16x128xf32>
    %7 = math.exp %6 : vector<16x128xf32>
    %cst_5 = arith.constant 1.000000e+00 : f32
    %8 = vector.broadcast %cst_5 : f32 to vector<16x128xf32>
    %9 = arith.addf %8, %7 : vector<16x128xf32>
    %10 = arith.divf %8, %9 : vector<16x128xf32>
    %11 = arith.truncf %10 : vector<16x128xf32> to vector<16x128xbf16>
    %c0_6 = arith.constant 0 : index
    %c0_7 = arith.constant 0 : index
    %12 = vector.load %arg4[%c0_6, %c0_7] : memref<128x128xbf16, #tpu.memory_space<vmem>>, vector<128x128xbf16>
    %cst_8 = arith.constant dense<0.000000e+00> : vector<16x128xf32>
    %13 = tpu.matmul %11, %12, %cst_8 {dimension_numbers = #tpu.dot_dimension_numbers<[1], [0], [0], [1], [0, 0, 1, 1], [], []>} : vector<16x128xbf16>, vector<128x128xbf16>, vector<16x128xf32> -> vector<16x128xf32>
    %c0_9 = arith.constant 0 : index
    %c0_10 = arith.constant 0 : index
    %14 = vector.load %arg5[%c0_9, %c0_10] : memref<1x128xf32, #tpu.memory_space<vmem>>, vector<1x128xf32>
    %15 = vector.broadcast %14 : vector<1x128xf32> to vector<16x128xf32>
    %16 = arith.addf %13, %15 : vector<16x128xf32>
    %c0_11 = arith.constant 0 : index
    %c0_12 = arith.constant 0 : index
    %17 = vector.load %arg6[%c0_11, %c0_12] : memref<16x128xf32, #tpu.memory_space<vmem>>, vector<16x128xf32>
    tpu.vector_store %arg6[%c0_11, %c0_12], %16 {strides = array<i32>} : memref<16x128xf32, #tpu.memory_space<vmem>>, vector<16x128xf32>,
    return
  }
  func.func @transform_0(%arg0: i32) -> (i32, i32) {
    %c0_i32 = arith.constant 0 : i32
    %c0_i32_0 = arith.constant 0 : i32
    return %arg0, %c0_i32 : i32, i32
  }
  func.func @transform_1(%arg0: i32) -> (i32, i32) {
    %c0_i32 = arith.constant 0 : i32
    %c0_i32_0 = arith.constant 0 : i32
    %c0_i32_1 = arith.constant 0 : i32
    return %c0_i32, %c0_i32_0 : i32, i32
  }
  func.func @transform_2(%arg0: i32) -> (i32, i32) {
    %c0_i32 = arith.constant 0 : i32
    %c0_i32_0 = arith.constant 0 : i32
    %c0_i32_1 = arith.constant 0 : i32
    return %c0_i32, %c0_i32_0 : i32, i32
  }
  func.func @transform_3(%arg0: i32) -> (i32, i32) {
    %c0_i32 = arith.constant 0 : i32
    %c0_i32_0 = arith.constant 0 : i32
    %c0_i32_1 = arith.constant 0 : i32
    return %c0_i32, %c0_i32_0 : i32, i32
  }
  func.func @transform_4(%arg0: i32) -> (i32, i32) {
    %c0_i32 = arith.constant 0 : i32
    %c0_i32_0 = arith.constant 0 : i32
    %c0_i32_1 = arith.constant 0 : i32
    return %c0_i32, %c0_i32_0 : i32, i32
  }
  func.func @transform_5(%arg0: i32) -> (i32, i32) {
    %c0_i32 = arith.constant 0 : i32
    %c0_i32_0 = arith.constant 0 : i32
    return %arg0, %c0_i32 : i32, i32
  }
}

</mosaic_0001>

<bundles_post_ra>
// kernel: tpu_custom_call.1
= control target key start
LH: loop header
LB: loop body
LE: loop exit
PB: predicated region body
PF: predicated region fallthrough
CT: control target
= control target key end

     0   :  { %10 = vsyncpa [#allocation3], 0  ;;  %s1220_s0 = inlined_call_operand.hbm [shape: bf16[64,128], index: 0, kind: input, shape index: {}]   ;;  %s1221_s1 = inlined_call_operand.hbm [shape: bf16[128,128], index: 1, kind: input, shape index: {}]   ;;  %s1222_s2 = inlined_call_operand.vmem [shape: f32[1,128], index: 2, kind: input, shape index: {}]   ;;  %s1223_s3 = inlined_call_operand.hbm [shape: bf16[128,128], index: 3, kind: input, shape index: {}]   ;;  %s1224_s4 = inlined_call_operand.vmem [shape: f32[1,128], index: 4, kind: input, shape index: {}]   ;;  %s1225_s5 = inlined_call_operand.hbm [shape: f32[64,128], index: 5, kind: output, shape index: {}]  }
   0x1   :  { %12 = vsyncpa [#allocation3 + $0x1], 0 }
   0x2   :  { %13 = vsyncpa [#allocation6], 0 }
   0x3   :  { %14 = vsyncpa [#allocation4], 0 }
   0x4   :  { %16 = vsyncpa [#allocation4 + $0x1], 0  ;;  %s1015_s18 = smov 0   ;;  %s1017_s19 = smov 0  }
   0x5   :  { %s1019_s20 = smov 0   ;;  %s1021_s21 = smov 0  }
   0x6 LB: > { %s1036_s22 = sadd.s32 4294967295, %s973_s21   ;;  %s628_s23 = sadd.s32 4294967294, %s973_s21   ;;  %s973_s21 = sphi %s1021_s21, %s1247_s21   ;;  %s969_s20 = sphi %s1019_s20, %s1246_s20   ;;  %s965_s19 = sphi %s1017_s19, %s1245_s19   ;;  %s961_s18 = sphi %s1015_s18, %s1244_s18  }
   0x7   : > { %p42_p0 = scmp.ne.s32.totalorder %s965_s19, %s961_s18  ;;  %p1226_p1 = scmp.eq.s32.totalorder %s1036_s22, 0 }
   0x8   : > { %p150_p2 = scmp.eq.s32.totalorder %s1036_s22, 3  ;;  %p156_p3 = scmp.eq.s32.totalorder %s628_s23, 3 }
   0x9   : > { %p1045_p4 = por %p1226_p1, %p42_p0  ;;  %p629_p5 = scmp.ge.s32.totalorder %s973_s21, 1 }
   0xa   : > { %p1050_p6 = por %p156_p3, %p42_p0  ;;  %p163_p7 = scmp.lt.s32.totalorder %s973_s21, 5 }
   0xb   : > { %s1231_s24 = scalar_select %p1045_p4, 1, 0 }
   0xc   : > { %s1232_s25 = scalar_select %p1050_p6, 1, 0 }
   0xd   : > { %p1055_p8 = pnand %p629_p5, %p163_p7  ;;  %s975_s27 = smov [#allocation5]  }
   0xe   : > { %s175_s28 = sshll.u32 %s975_s27, 4  ;;  %s976_s30 = smov [#allocation7]   ;;  %s176_s28 = int_to_ptr.vmem [resolvable:$true] %s175_s28 }
   0xf   : > { %s1233_s26 = scalar_select %p1055_p8, 1, 0 }
  0x10   : > { %p739_p9 = pneg %p1055_p8  ;;  %s191_s6 = sshll.u32 %s976_s30, 4  ;;  %s192_s6 = int_to_ptr.vmem [resolvable:$true] %s191_s6 }
  0x11   : > { %s836_s7 = scalar_lea.vmem %s176_s28, 1024  ;;  %p844_p3 = scmp.lt.s32.totalorder %s176_s28, %s176_s28 }
  0x12   : > { %p1063_p10 = pnand %p739_p9, %p1226_p1  ;;  %p837_p12 = scmp.ne.s32.totalorder %s176_s28, %s836_s7 }
  0x13   : > { %p845_p5 = scmp.lt.s32.totalorder %s836_s7, %s836_s7 }
  0x14   : > { %p827_p11 = pneg %p1063_p10 }
  0x15   : > { %p846_p7 = por %p845_p5, %p844_p3 }
  0x16   : > { %p839_p13 = pnand %p837_p12, %p827_p11 }
  0x18   : > { %p840_p0 = pneg %p839_p13 }
  0x1a   : > { %p847_p9 = pnand %p846_p7, %p840_p0 }
  0x1c   : > { %850 = shalt.err (!%p847_p9)
}
  0x1d   : > { %s1227_s8 = smov 64   ;;  %s978_s9 = smov 4  }
  0x1e   : > { %742 = dma.hbm_to_vmem [thread:$0]  (!%p1063_p10), %s1221_s1, 1024, %s176_s28, [#allocation6], %s1227_s8, %s1227_s8, %s978_s9  }
  0x1f   : > { %s862_s12 = scalar_lea.vmem %s192_s6, 1024  ;;  %p870_p0 = scmp.lt.s32.totalorder %s192_s6, %s192_s6 }
  0x20   : > { %p863_p12 = scmp.ne.s32.totalorder %s192_s6, %s862_s12  ;;  %p871_p5 = scmp.lt.s32.totalorder %s862_s12, %s862_s12 }
  0x22   : > { %p865_p13 = pnand %p863_p12, %p827_p11  ;;  %p872_p7 = por %p871_p5, %p870_p0 }
  0x24   : > { %p866_p3 = pneg %p865_p13 }
  0x26   : > { %p873_p9 = pnand %p872_p7, %p866_p3 }
  0x28   : > { %876 = shalt.err (!%p873_p9)
}
  0x29   : > { %745 = dma.hbm_to_vmem [thread:$0]  (!%p1063_p10), %s1223_s3, 1024, %s192_s6, [#allocation6], %s1227_s8, %s1227_s8, %s978_s9  }
  0x2a   : > { %s1092_s15 = sadd.s32 1, %s973_s21   ;;  %s29_s16 = sadd.s32 1, %s969_s20 }
  0x2b   : > { %s26_s17 = ssub.s32 %s973_s21, %s1092_s15  ;;  %p36_p11 = scmp.ne.s32.totalorder %s969_s20, %s965_s19 }
  0x2c   : > { %p27_p12 = scmp.eq.s32.totalorder %s26_s17, 0  ;;  %p37_p13 = scmp.eq.s32.totalorder %s973_s21, 0 }
  0x2d   : > { %p1102_p3 = por %p150_p2, %p36_p11  ;;  %p756_p0 = scmp.lt.s32.totalorder %s973_s21, 4 }
  0x2e   : > { %s1108_s27 = scalar_select %p27_p12, %s969_s20, %s29_s16  }
  0x2f   : > { %s1235_s23 = scalar_select %p1102_p3, 1, 0 }
  0x30   : > { %p38_p5 = por %p37_p13, %p36_p11  ;;  %s208_s28 = sand.u32 1, %s969_s20  }
  0x31   : > { %s633_s29 = sshll.u32 %s208_s28, 3  ;;  %s667_s30 = sshll.u32 %s973_s21, 7 }
  0x32   : > { %s1115_s10 = scalar_lea.hbm %s1220_s0, %s667_s30  ;;  %s212_s11 = scalar_lea.vmem [#allocation2], %s633_s29 }
  0x33   : > { %s219_s12 = sshll.u32 %s212_s11, 4  ;;  %p1119_p2 = pnand %p756_p0, %p38_p5  ;;  %s1117_s12 = int_to_ptr.vmem [resolvable:$true] %s219_s12 }
  0x34   : > { %s1123_s14 = scalar_lea.sflag [#allocation3], %s208_s28  ;;  %s877_s16 = scalar_lea.hbm %s1115_s10, 128 }
  0x35   : > { %p878_p10 = scmp.ne.s32.totalorder %s1115_s10, %s877_s16  ;;  %p879_p7 = pneg %p1119_p2 }
  0x36   : > { %s882_s29 = scalar_lea.hbm %s1220_s0, 512  ;;  %p883_p12 = scmp.lt.s32.totalorder %s1115_s10, %s1220_s0 }
  0x37   : > { %p880_p9 = pnand %p879_p7, %p878_p10  ;;  %p884_p13 = scmp.lt.s32.totalorder %s882_s29, %s877_s16 }
  0x39   : > { %p881_p11 = pneg %p880_p9  ;;  %p885_p0 = por %p884_p13, %p883_p12 }
  0x3b   : > { %p886_p5 = pnand %p885_p0, %p881_p11 }
  0x3d   : > { %889 = shalt.err (!%p886_p5)
}
  0x3e   : > { %s890_s28 = scalar_lea.vmem %s1117_s12, 128  ;;  %s979_s11 = smov [#allocation2]  }
  0x3f   : > { %p891_p1 = scmp.ne.s32.totalorder %s1117_s12, %s890_s28  ;;  %s895_s8 = sshll.u32 %s979_s11, 4  ;;  %s896_s8 = int_to_ptr.vmem [resolvable:$false] %s895_s8 }
  0x40   : > { %s897_s17 = scalar_lea.vmem %s896_s8, 256  ;;  %p898_p9 = scmp.lt.s32.totalorder %s1117_s12, %s896_s8 }
  0x41   : > { %p893_p6 = pnand %p891_p1, %p879_p7  ;;  %p899_p3 = scmp.lt.s32.totalorder %s897_s17, %s890_s28 }
  0x43   : > { %p894_p10 = pneg %p893_p6  ;;  %p900_p4 = por %p899_p3, %p898_p9 }
  0x45   : > { %p901_p8 = pnand %p900_p4, %p894_p10 }
  0x47   : > { %904 = shalt.err (!%p901_p8)
}
  0x48   : > { %s1237_s16 = smov 64   ;;  %p1238_p1 = scmp.ne.s32.totalorder %s1233_s26, 0 }
  0x49   : > { %749 = dma.hbm_to_vmem [thread:$0]  (!%p1119_p2), %s1115_s10, 128, %s1117_s12, %s1123_s14, %s1237_s16, %s1237_s16, %s978_s9  }
  0x4a   : > { %231 = sbr.rel (%p1238_p1) target bundleno = 563 (0x233), region = 40  ;;  %s1150_s30 = sand.u32 (!%p1238_p1), 1, %s965_s19  }
  0x4b   : > { %s637_s8 = sshll.u32 (!%p1238_p1), %s1150_s30, 3  ;;  %s234_s29 = scalar_lea.sflag (!%p1238_p1), [#allocation3], %s1150_s30 }
  0x4c   : > { %s1154_s6 = scalar_lea.vmem (!%p1238_p1), [#allocation2], %s637_s8  ;;  %p1239_p4 = scmp.ne.s32.totalorder (!%p1238_p1), %s1231_s24, 0 }
  0x4f   : > { %948 = dma.done.wait (%p1239_p4), %s234_s29, 128  }
  0x50   : > { %950 = vsyncadd (%p1239_p4), %s234_s29, 4294967168  ;;  %p1240_p6 = scmp.eq.s32.totalorder %s1036_s22, 0 }
  0x52   : > { %952 = dma.done.wait (%p1240_p6), [#allocation6], 2048   ;;  %p1241_p8 = pmov %p1240_p6 }
  0x53   : > { %v980_v0 = vmov 0.0   ;;  %vm981_vm0 = vmmov 0   ;;  %v800_v1 = vld [vmem:[#allocation5 + $0x38] sm:$0xff]   ;;  %v801_v2 = vld [vmem:[#allocation5 + $0x30] sm:$0xff]   ;;  %v802_v3 = vld [vmem:[#allocation5 + $0x28] sm:$0xff]   ;;  %s640_s9 = sshll.u32 %s1150_s30, 4 }
  0x54   : > { %954 = vsyncadd (%p1241_p8), [#allocation6], 4294965248  ;;  %687 = vmatprep.subr.bf16.mxu0 %v980_v0  ;;  %703 = vmatprep.mubr.msk.bf16.mxu0 %vm981_vm0, %v980_v0  ;;  %v803_v4 = vld [vmem:[#allocation5 + $0x20] sm:$0xff]   ;;  %v804_v5 = vld [vmem:[#allocation5 + $0x18] sm:$0xff]   ;;  %s271_s13 = scalar_lea.vmem [#allocation8], %s640_s9  ;;  %s668_s7 = sshll.u32 %s1036_s22, 8 }
  0x55   : > { %707 = vmatprep.subr.bf16.mxu1 %v980_v0  ;;  %723 = vmatprep.mubr.msk.bf16.mxu1 %vm981_vm0, %v980_v0  ;;  %v805_v6 = vld [vmem:[#allocation5 + $0x10] sm:$0xff]   ;;  %v806_v7 = vld [vmem:[#allocation5 + $0x8] sm:$0xff]   ;;  %v807_v8 = vld [vmem:[#allocation5] sm:$0xff]   ;;  %s536_s14 = sshll.u32 %s271_s13, 4  ;;  %s1178_s17 = scalar_lea.hbm %s1225_s5, %s668_s7  ;;  %s1173_s14 = int_to_ptr.vmem [resolvable:$true] %s536_s14 }
  0x56   : > { %688 = vmatpush3.bf16.msra.mxu0 %v800_v1  ;;  %v808_v9 = vld [vmem:[%s1154_s6] sm:$0xff]   ;;  %v811_v12 = vld [vmem:[#allocation7 + $0x28] sm:$0xff]   ;;  %v812_v13 = vld [vmem:[#allocation7 + $0x20] sm:$0xff]   ;;  %s523_s16 = scalar_lea.sflag [#allocation4], %s1150_s30  ;;  %s905_s8 = scalar_lea.vmem %s1173_s14, 256 }
  0x57   : > { %689 = vmatprep.subr.bf16.mxu0 %v980_v0  ;;  %v809_v10 = vld [vmem:[#allocation7 + $0x38] sm:$0xff]   ;;  %v810_v11 = vld [vmem:[#allocation7 + $0x30] sm:$0xff]   ;;  %v815_v16 = vld [vmem:[#allocation7 + $0x8] sm:$0xff]   ;;  %p906_p3 = scmp.ne.s32.totalorder %s1173_s14, %s905_s8  ;;  %p1242_p2 = scmp.ne.s32.totalorder %s1235_s23, 0 }
  0x58   : > { %708 = vmatpush3.bf16.msra.mxu1 %v809_v10  ;;  %v813_v14 = vld [vmem:[#allocation7 + $0x18] sm:$0xff]   ;;  %v814_v15 = vld [vmem:[#allocation7 + $0x10] sm:$0xff]   ;;  %v816_v17 = vld [vmem:[#allocation7] sm:$0xff]   ;;  %s982_s22 = smov [#allocation8]  }
  0x59   : > { %709 = vmatprep.subr.bf16.mxu1 %v980_v0  ;;  %v641_v18 = vld [vmem:[%s1222_s2] ss:$0 sm:$0xff]  ;;  %p907_p7 = pnand %p906_p3, %p1242_p2  ;;  %s909_s29 = sshll.u32 %s982_s22, 4  ;;  %s910_s29 = int_to_ptr.vmem [resolvable:$false] %s909_s29 }
  0x5a   : > { %690 = vmatpush3.bf16.msra.mxu0 %v801_v2  ;;  %v653_v34 = vld [vmem:[%s1224_s4] ss:$0 sm:$0xff]  ;;  %s911_s6 = scalar_lea.vmem %s910_s29, 512  ;;  %p912_p12 = scmp.lt.s32.totalorder %s1173_s14, %s910_s29 }
  0x5b   : > { %691 = vmatprep.subr.bf16.mxu0 %v980_v0  ;;  %p908_p11 = pneg %p907_p7  ;;  %p913_p13 = scmp.lt.s32.totalorder %s911_s6, %s905_s8 }
  0x5c   : > { %710 = vmatpush3.bf16.msra.mxu1 %v810_v11 }
  0x5d   : > { %711 = vmatprep.subr.bf16.mxu1 %v980_v0  ;;  %p914_p0 = por %p913_p13, %p912_p12 }
  0x5e   : > { %692 = vmatpush3.bf16.msra.mxu0 %v802_v3 }
  0x5f   : > { %693 = vmatprep.subr.bf16.mxu0 %v980_v0  ;;  %p915_p5 = pnand %p914_p0, %p908_p11 }
  0x60   : > { %712 = vmatpush3.bf16.msra.mxu1 %v811_v12 }
  0x61   : > { %713 = vmatprep.subr.bf16.mxu1 %v980_v0 }
  0x62   : > { %694 = vmatpush3.bf16.msra.mxu0 %v803_v4 }
  0x63   : > { %695 = vmatprep.subr.bf16.mxu0 %v980_v0 }
  0x64   : > { %714 = vmatpush3.bf16.msra.mxu1 %v812_v13 }
  0x65   : > { %715 = vmatprep.subr.bf16.mxu1 %v980_v0 }
  0x66   : > { %696 = vmatpush3.bf16.msra.mxu0 %v804_v5 }
  0x67   : > { %697 = vmatprep.subr.bf16.mxu0 %v980_v0 }
  0x68   : > { %716 = vmatpush3.bf16.msra.mxu1 %v813_v14 }
  0x69   : > { %717 = vmatprep.subr.bf16.mxu1 %v980_v0 }
  0x6a   : > { %698 = vmatpush3.bf16.msra.mxu0 %v805_v6 }
  0x6b   : > { %699 = vmatprep.subr.bf16.mxu0 %v980_v0 }
  0x6c   : > { %718 = vmatpush3.bf16.msra.mxu1 %v814_v15 }
  0x6d   : > { %719 = vmatprep.subr.bf16.mxu1 %v980_v0 }
  0x6e   : > { %700 = vmatpush3.bf16.msra.mxu0 %v806_v7 }
  0x6f   : > { %701 = vmatprep.subr.bf16.mxu0 %v980_v0 }
  0x70   : > { %720 = vmatpush3.bf16.msra.mxu1 %v815_v16 }
  0x71   : > { %721 = vmatprep.subr.bf16.mxu1 %v980_v0 }
  0x72   : > { %702 = vmatpush3.bf16.msra.mxu0 %v807_v8 }
  0x74   : > { %722 = vmatpush3.bf16.msra.mxu1 %v816_v17 }
  0x75   : > { %704 = vmatmul.mubr.bf16.vlgmr.msra.gmra.mxu0 %v808_v9 }
 0x135   : > { %v388_v19 = vpop.f32.mrf.mxu0 }
 0x136   : > { %v389_v20 = vadd.f32 %v641_v18, %v388_v19 }
 0x137   : > { %v705_v21 = vpop.f32.mrf.mxu0 }
 0x138   : > { %v651_v22 = vmul.f32 -1.442695, %v389_v20 }
 0x139   : > { %v391_v23 = vpop.f32.mrf.mxu0 }
 0x13a   : > { %817 = vpow2.f32 %v651_v22  ;;  %v392_v24 = vadd.f32 %v641_v18, %v391_v23 }
 0x13b   : > { %v706_v25 = vpop.f32.mrf.mxu0 }
 0x13c   : > { %v652_v26 = vmul.f32 -1.442695, %v392_v24 }
 0x13e   : > { %819 = vpow2.f32 %v652_v26 }
 0x147   : > { %v818_v27 = vpop.eup %817 }
 0x148   : > { %v401_v28 = vadd.f32 1.0, %v818_v27 }
 0x14a   : > { %821 = vrcp.f32 %v401_v28 }
 0x14b   : > { %v820_v29 = vpop.eup %819 }
 0x14c   : > { %v402_v30 = vadd.f32 1.0, %v820_v29 }
 0x14e   : > { %823 = vrcp.f32 %v402_v30 }
 0x157   : > { %v822_v31 = vpop.eup %821 }
 0x15b   : > { %v824_v32 = vpop.eup %823 }
 0x15c   : > { %v407_v33 = vpack.c.bf16 %v824_v32, %v822_v31 }
 0x15e   : > { %724 = vmatmul.mubr.bf16.vlgmr.msra.gmra.mxu1 %v407_v33 }
 0x21e   : > { %v513_v35 = vpop.f32.mrf.mxu1 }
 0x21f   : > { %v514_v36 = vadd.f32 %v653_v34, %v513_v35 }
 0x220   : > { %v725_v37 = vpop.f32.mrf.mxu1 }
 0x221   : > { %520 = vst [vmem:[%s271_s13] sm:$0xff] %v514_v36 }
 0x222   : > { %v516_v38 = vpop.f32.mrf.mxu1 }
 0x223   : > { %v517_v39 = vadd.f32 %v653_v34, %v516_v38 }
 0x224   : > { %v726_v40 = vpop.f32.mrf.mxu1 }
 0x225   : > { %521 = vst [vmem:[%s271_s13 + $0x8] sm:$0xff] %v517_v39 }
 0x226   : > { %918 = shalt.err (!%p915_p5)
}
 0x227   : > { %s919_s24 = scalar_lea.hbm %s1178_s17, 256  ;;  %s923_s10 = scalar_lea.hbm %s1225_s5, 1024 }
 0x228   : > { %p920_p10 = scmp.ne.s32.totalorder %s1178_s17, %s919_s24  ;;  %p924_p4 = scmp.lt.s32.totalorder %s1178_s17, %s1225_s5 }
 0x229   : > { %p925_p6 = scmp.lt.s32.totalorder %s923_s10, %s919_s24 }
 0x22a   : > { %p921_p9 = pnand %p920_p10, %p1242_p2 }
 0x22b   : > { %p926_p8 = por %p925_p6, %p924_p4 }
 0x22c   : > { %p922_p1 = pneg %p921_p9 }
 0x22e   : > { %p927_p3 = pnand %p926_p8, %p922_p1 }
 0x230   : > { %930 = shalt.err (!%p927_p3)
}
 0x231   : > { %s983_s7 = smov 128   ;;  %s984_s28 = smov 8  }
 0x232   : > { %737 = dma.vmem_to_hbm [thread:$0]  (%p1242_p2), %s1173_s14, 256, %s1178_s17, %s523_s16, %s983_s7, %s983_s7, %s984_s28  }
 0x233 PF: > { %p759_p7 = scmp.ge.s32.totalorder %s973_s21, 2  ;;  %s551_s11 = sand.u32 1, %s961_s18  }
 0x234   : > { %p1243_p11 = scmp.ne.s32.totalorder %s1232_s25, 0  ;;  %s552_s8 = scalar_lea.sflag [#allocation4], %s551_s11 }
 0x236   : > { %p751_p12 = pnand %p759_p7, %p1243_p11 }
 0x238   : > { %p752_p13 = pneg %p751_p12 }
 0x23a   : > { %956 = dma.done.wait (%p752_p13), %s552_s8, 256  }
 0x23b   : > { %958 = vsyncadd (%p752_p13), %s552_s8, 4294967040  ;;  %p19_p0 = scmp.ge.s32.totalorder %s1092_s15, 6   ;;  %s1244_s18 = smov %s965_s19 }
 0x23c   : > { %s1245_s19 = smov %s969_s20  ;;  %s1246_s20 = smov %s1108_s27 }
 0x23d   : > { %s1247_s21 = smov %s1092_s15  ;;  %21 = sbr.rel (!%p19_p0) target bundleno = 6 (0x6), region = 93 }
 0x242   :  { %557 = vsyncpa [#allocation3], 1 }
 0x243   :  { %559 = vsyncpa [#allocation3 + $0x1], 1 }
 0x244   :  { %560 = vsyncpa [#allocation6], 1 }
 0x245   :  { %561 = vsyncpa [#allocation4], 1 }
 0x246   :  { %563 = vsyncpa [#allocation4 + $0x1], 1 }

</bundles_post_ra>
